<compile_context>
chip_gen: v7x
topology: tpu7x:2x2x1
jax: 0.10.0
libtpu: 0.0.40
codegen_flags: <defaults>
</compile_context>

<pallas_src>
import functools

import jax
import jax.numpy as jnp
from jax import lax
from jax.experimental import pallas as pl
from jax.experimental.pallas import tpu as pltpu

LANES = 128
SUBLANES = 8
ALIGN = SUBLANES * LANES           # kernel consumes multiples of 1024 elements
DEFAULT_BLOCK_BYTES = 4 << 20      # ~4 MiB per input block (dtype-aware rows)
CHUNK_ROWS = 512                   # in-kernel sub-tile (bounds live vregs)
NUM_CORES = 2                      # leading "parallel" axis for v7x's 2 TCs
# TODO(synk): switch the leading axis to pltpu.CORE_PARALLEL once verified it
# shards across v7x TensorCores; plain "parallel" compiles on all chips.


def _loss1_kernel(x_ref, y_ref, out_ref, acc_ref, *,
                  total_rows, blocks_per_core, block_rows, chunk_rows):
    c = pl.program_id(0)           # core index ("parallel")
    i = pl.program_id(1)           # reduction step within this core

    @pl.when(i == 0)
    def _():
        acc_ref[...] = jnp.zeros_like(acc_ref)

    b = c * blocks_per_core + i    # unclamped global block index
    row0 = b * block_rows
    n_chunks = block_rows // chunk_rows
    # Edge blocks: the partial last real block, or a clamped duplicate block
    # assigned past the end of this core's share (its index_map was clamped,
    # so it re-reads valid data that must be fully discarded).
    is_edge = row0 + block_rows > total_rows

    def accumulate(x, y, valid):
        m = x > y
        if valid is not None:
            m = jnp.logical_and(m, valid)
        diff = jnp.where(m, x - y, 0.0)            # |y - x| == x - y where x > y
        # Collapse rows in groups of 8 into the resident vreg-shaped
        # accumulator; all VPU adds, no per-step cross-lane reduction.
        acc_ref[0] += jnp.sum(diff.reshape(-1, SUBLANES, LANES), axis=0)
        acc_ref[1] += jnp.sum(m.astype(jnp.float32).reshape(-1, SUBLANES, LANES),
                              axis=0)

    @pl.when(jnp.logical_not(is_edge))
    def _():                                        # fast path: no mask at all
        def body(j, carry):
            r = pl.multiple_of(j * chunk_rows, chunk_rows)
            x = x_ref[pl.ds(r, chunk_rows), :].astype(jnp.float32)
            y = y_ref[pl.ds(r, chunk_rows), :].astype(jnp.float32)
            accumulate(x, y, None)
            return carry
        lax.fori_loop(0, n_chunks, body, 0)

    @pl.when(is_edge)
    def _():                                        # masked path (rare)
        def body(j, carry):
            r = pl.multiple_of(j * chunk_rows, chunk_rows)
            x = x_ref[pl.ds(r, chunk_rows), :].astype(jnp.float32)
            y = y_ref[pl.ds(r, chunk_rows), :].astype(jnp.float32)
            local = lax.broadcasted_iota(jnp.int32, (chunk_rows, LANES), 0)
            valid = (row0 + r + local) < total_rows
            accumulate(x, y, valid)
            return carry
        lax.fori_loop(0, n_chunks, body, 0)

    @pl.when(i == pl.num_programs(1) - 1)
    def _():
        out_ref[0] = acc_ref[...]                   # per-core (sum, count) partials


def _partial_sums(x2, y2, *, rows, block_rows, chunk_rows, num_cores,
                  bytes_accessed, n_elems):
    nb = pl.cdiv(rows, block_rows)
    blocks_per_core = pl.cdiv(nb, num_cores)

    def in_map(c, i):
        # Clamp so blocks assigned past the end still DMA in-bounds data; the
        # kernel's edge path discards their contribution entirely.
        return (jnp.minimum(c * blocks_per_core + i, nb - 1), 0)

    kernel = functools.partial(
        _loss1_kernel,
        total_rows=rows,
        blocks_per_core=blocks_per_core,
        block_rows=block_rows,
        chunk_rows=chunk_rows,
    )

    return pl.pallas_call(
        kernel,
        out_shape=jax.ShapeDtypeStruct((num_cores, 2, SUBLANES, LANES), jnp.float32),
        grid_spec=pltpu.PrefetchScalarGridSpec(
            num_scalar_prefetch=0,
            grid=(num_cores, blocks_per_core),
            in_specs=[
                pl.BlockSpec((block_rows, LANES), in_map),
                pl.BlockSpec((block_rows, LANES), in_map),
            ],
            out_specs=pl.BlockSpec((1, 2, SUBLANES, LANES),
                                   lambda c, i: (c, 0, 0, 0)),
            scratch_shapes=[pltpu.VMEM((2, SUBLANES, LANES), jnp.float32)],
        ),
        compiler_params=pltpu.CompilerParams(
            dimension_semantics=("parallel", "arbitrary"),
            vmem_limit_bytes=40 << 20,
        ),
        cost_estimate=pl.CostEstimate(
            flops=3 * n_elems,
            transcendentals=0,
            bytes_accessed=bytes_accessed,
        ),
    )(x2, y2)


def loss1_pallas(x, y, *, block_bytes=DEFAULT_BLOCK_BYTES):
    """Mean of |y - x| over elements where x > y; 0.0 if no such element.

    Matches Loss1.forward (except the count==0 case returns a 0.0 f32 array
    rather than the Python int 0).
    """
    print(f"x.shape {x.shape}")   # mirrors the torch module's print (trace-time)

    xf = jnp.ravel(x)
    yf = jnp.ravel(y)
    assert xf.shape == yf.shape, "x and y must have the same number of elements"
    n = int(xf.shape[0])
    if n == 0:
        return jnp.float32(0.0)

    # The kernel consumes the aligned prefix (multiple of 8*128 = 1024
    # elements: always a free reshape, never a pad/copy of the big arrays).
    # The <1024-element ragged tail is reduced with plain jnp ops.
    n_main = (n // ALIGN) * ALIGN

    if n_main < n:
        xt = lax.slice(xf, (n_main,), (n,)).astype(jnp.float32)
        yt = lax.slice(yf, (n_main,), (n,)).astype(jnp.float32)
        mt = xt > yt
        tail_sum = jnp.sum(jnp.where(mt, xt - yt, jnp.float32(0.0)))
        tail_cnt = jnp.sum(mt.astype(jnp.float32))
    else:
        tail_sum = jnp.float32(0.0)
        tail_cnt = jnp.float32(0.0)

    if n_main == 0:
        total, count = tail_sum, tail_cnt
    else:
        rows = n_main // LANES                       # multiple of 8
        if n_main == n:
            x_head, y_head = xf, yf                  # free reshape below
        else:
            x_head = lax.slice(xf, (0,), (n_main,))
            y_head = lax.slice(yf, (0,), (n_main,))
        x2 = x_head.reshape(rows, LANES)
        y2 = y_head.reshape(rows, LANES)

        # Dtype-aware block sizing: ~block_bytes per input block, rounded to a
        # multiple of CHUNK_ROWS so in-kernel sub-tiling divides evenly.
        itemsize = x2.dtype.itemsize
        target_rows = max(CHUNK_ROWS,
                          (block_bytes // (LANES * itemsize)) // CHUNK_ROWS * CHUNK_ROWS)
        if rows >= CHUNK_ROWS:
            block_rows = min(target_rows, (rows // CHUNK_ROWS) * CHUNK_ROWS)
            chunk_rows = CHUNK_ROWS
        else:
            block_rows = rows            # tiny input: single-shot block
            chunk_rows = rows

        nb = pl.cdiv(rows, block_rows)
        num_cores = NUM_CORES if nb >= 2 else 1   # no 2-way split for 1 block

        partials = _partial_sums(
            x2, y2, rows=rows, block_rows=block_rows, chunk_rows=chunk_rows,
            num_cores=num_cores,
            bytes_accessed=n_main * (x2.dtype.itemsize + y2.dtype.itemsize),
            n_elems=n_main)

        total = jnp.sum(partials[:, 0]) + tail_sum
        count = jnp.sum(partials[:, 1]) + tail_cnt

    return jnp.where(count > 0, total / jnp.maximum(count, 1.0), jnp.float32(0.0))


def _loss1_ref(x, y):
    xf = jnp.ravel(x).astype(jnp.float32)
    yf = jnp.ravel(y).astype(jnp.float32)
    mask = xf > yf
    cnt = jnp.sum(mask.astype(jnp.float32))
    s = jnp.sum(jnp.where(mask, xf - yf, 0.0))
    return jnp.where(cnt > 0, s / jnp.maximum(cnt, 1.0), 0.0)


if __name__ == "__main__":
    key = jax.random.PRNGKey(0)
    k1, k2, k3, k4, k5 = jax.random.split(key, 5)

    def check(shape, k, **kw):
        kx, ky = jax.random.split(k)
        x = jax.random.normal(kx, shape, dtype=jnp.float32)
        y = jax.random.normal(ky, shape, dtype=jnp.float32)
        out = jax.block_until_ready(loss1_pallas(x, y, **kw))
        ref = _loss1_ref(x, y)
        assert jnp.allclose(out, ref, rtol=1e-5, atol=1e-6), (shape, out, ref)

    # Primary small case (aligned): single-block fast path through the kernel.
    check((2, 4, 16, 16), k1)

    # Ragged tiny input (<1024 elements): pure-jnp tail path.
    check((3, 7, 11), k2)

    # Multi-block, 2-core split, partial last block + clamped duplicate block
    # (small block_bytes forces several blocks without a huge test array).
    check((12, 100, 128), k3, block_bytes=256 << 10)

    # Aligned prefix through the kernel + <1024-element ragged tail in jnp.
    check((5, 300, 7), k4)

    # No element with x > y -> count == 0 branch returns 0.0.
    xz = -jnp.abs(jax.random.normal(k5, (2, 4, 16, 16), dtype=jnp.float32)) - 1.0
    yz = jnp.zeros_like(xz)
    out0 = jax.block_until_ready(loss1_pallas(xz, yz))
    assert jnp.allclose(out0, 0.0), out0

    print("KERNEL_OK")
</pallas_src>

<mosaic_0001>
module attributes {stable_mosaic.version = 11 : i64} {
  func.func @_loss1_kernel(%arg0: i32, %arg1: i32, %arg2: memref<16x128xf32, #tpu.memory_space<vmem>>, %arg3: memref<16x128xf32, #tpu.memory_space<vmem>>, %arg4: memref<1x2x8x128xf32, #tpu.memory_space<vmem>>, %arg5: memref<2x8x128xf32, #tpu.memory_space<vmem>>) attributes {dimension_semantics = [#tpu.dimension_semantics<parallel>, #tpu.dimension_semantics<arbitrary>], iteration_bounds = array<i64: 1, 1>, scalar_prefetch = 0 : i64, scratch_operands = 1 : i64, tpu.core_type = #tpu.core_type<tc>, window_params = [{transform_indices = @transform_0, window_bounds = array<i64: 16, 128>}, {transform_indices = @transform_1, window_bounds = array<i64: 16, 128>}, {transform_indices = @transform_2, window_bounds = array<i64: 1, 2, 8, 128>}]} {
    %c0_i32 = arith.constant 0 : i32
    %0 = arith.cmpi eq, %arg1, %c0_i32 : i32
    %1 = arith.extui %0 : i1 to i32
    %c0_i32_0 = arith.constant 0 : i32
    %2 = arith.cmpi ne, %1, %c0_i32_0 : i32
    scf.if %2 {
      %cst = arith.constant 0.000000e+00 : f32
      %16 = vector.broadcast %cst : f32 to vector<2x8x128xf32>
      %c0 = arith.constant 0 : index
      %c0_7 = arith.constant 0 : index
      %c0_8 = arith.constant 0 : index
      %17 = vector.load %arg5[%c0, %c0_7, %c0_8] : memref<2x8x128xf32, #tpu.memory_space<vmem>>, vector<2x8x128xf32>
      tpu.vector_store %arg5[%c0, %c0_7, %c0_8], %16 {strides = array<i32>} : memref<2x8x128xf32, #tpu.memory_space<vmem>>, vector<2x8x128xf32>,
    } else {
    }
    %c1_i32 = arith.constant 1 : i32
    %3 = arith.muli %arg0, %c1_i32 : i32
    %4 = arith.addi %3, %arg1 : i32
    %c16_i32 = arith.constant 16 : i32
    %5 = arith.muli %4, %c16_i32 : i32
    %c16_i32_1 = arith.constant 16 : i32
    %6 = arith.addi %5, %c16_i32_1 : i32
    %c16_i32_2 = arith.constant 16 : i32
    %7 = arith.cmpi sgt, %6, %c16_i32_2 : i32
    %true = arith.constant true
    %8 = arith.xori %7, %true : i1
    %9 = arith.extui %8 : i1 to i32
    %c0_i32_3 = arith.constant 0 : i32
    %10 = arith.cmpi ne, %9, %c0_i32_3 : i32
    scf.if %10 {
      %c0_i32_7 = arith.constant 0 : i32
      %c16_i32_8 = arith.constant 16 : i32
      %16 = arith.muli %c0_i32_7, %c16_i32_8 : i32
      %17 = tpu.assume_multiple %16, 16 : i32
      %18 = arith.index_cast %17 : i32 to index
      %c0 = arith.constant 0 : index
      %19 = vector.load %arg2[%18, %c0] : memref<16x128xf32, #tpu.memory_space<vmem>>, vector<16x128xf32>
      %20 = arith.index_cast %17 : i32 to index
      %c0_9 = arith.constant 0 : index
      %21 = vector.load %arg3[%20, %c0_9] : memref<16x128xf32, #tpu.memory_space<vmem>>, vector<16x128xf32>
      %22 = arith.cmpf ogt, %19, %21 : vector<16x128xf32>
      %23 = arith.subf %19, %21 : vector<16x128xf32>
      %cst = arith.constant 0.000000e+00 : f32
      %24 = vector.broadcast %cst : f32 to vector<16x128xf32>
      %25 = arith.select %22, %23, %24 : vector<16x128xi1>, vector<16x128xf32>
      %c0_10 = arith.constant 0 : index
      %c0_11 = arith.constant 0 : index
      %c0_12 = arith.constant 0 : index
      %26 = vector.load %arg5[%c0_10, %c0_11, %c0_12] : memref<2x8x128xf32, #tpu.memory_space<vmem>>, vector<1x8x128xf32>
      %27 = vector.shape_cast %26 : vector<1x8x128xf32> to vector<8x128xf32>
      %28 = vector.shape_cast %25 : vector<16x128xf32> to vector<2x8x128xf32>
      %cst_13 = arith.constant dense<0.000000e+00> : vector<8x128xf32>
      %29 = vector.multi_reduction <add>, %28, %cst_13 [0] : vector<2x8x128xf32> to vector<8x128xf32>
      %30 = arith.addf %27, %29 : vector<8x128xf32>
      %c0_14 = arith.constant 0 : index
      %c0_15 = arith.constant 0 : index
      %c0_16 = arith.constant 0 : index
      %31 = vector.load %arg5[%c0_14, %c0_15, %c0_16] : memref<2x8x128xf32, #tpu.memory_space<vmem>>, vector<1x8x128xf32>
      %32 = vector.shape_cast %31 : vector<1x8x128xf32> to vector<8x128xf32>
      %33 = vector.shape_cast %30 : vector<8x128xf32> to vector<1x8x128xf32>
      tpu.vector_store %arg5[%c0_14, %c0_15, %c0_16], %33 {strides = array<i32>} : memref<2x8x128xf32, #tpu.memory_space<vmem>>, vector<1x8x128xf32>,
      %c1 = arith.constant 1 : index
      %c0_17 = arith.constant 0 : index
      %c0_18 = arith.constant 0 : index
      %34 = vector.load %arg5[%c1, %c0_17, %c0_18] : memref<2x8x128xf32, #tpu.memory_space<vmem>>, vector<1x8x128xf32>
      %35 = vector.shape_cast %34 : vector<1x8x128xf32> to vector<8x128xf32>
      %36 = arith.extui %22 : vector<16x128xi1> to vector<16x128xi32>
      %37 = arith.sitofp %36 : vector<16x128xi32> to vector<16x128xf32>
      %38 = vector.shape_cast %37 : vector<16x128xf32> to vector<2x8x128xf32>
      %cst_19 = arith.constant dense<0.000000e+00> : vector<8x128xf32>
      %39 = vector.multi_reduction <add>, %38, %cst_19 [0] : vector<2x8x128xf32> to vector<8x128xf32>
      %40 = arith.addf %35, %39 : vector<8x128xf32>
      %c1_20 = arith.constant 1 : index
      %c0_21 = arith.constant 0 : index
      %c0_22 = arith.constant 0 : index
      %41 = vector.load %arg5[%c1_20, %c0_21, %c0_22] : memref<2x8x128xf32, #tpu.memory_space<vmem>>, vector<1x8x128xf32>
      %42 = vector.shape_cast %41 : vector<1x8x128xf32> to vector<8x128xf32>
      %43 = vector.shape_cast %40 : vector<8x128xf32> to vector<1x8x128xf32>
      tpu.vector_store %arg5[%c1_20, %c0_21, %c0_22], %43 {strides = array<i32>} : memref<2x8x128xf32, #tpu.memory_space<vmem>>, vector<1x8x128xf32>,
      %c1_i32_23 = arith.constant 1 : i32
    } else {
    }
    %11 = arith.extui %7 : i1 to i32
    %c0_i32_4 = arith.constant 0 : i32
    %12 = arith.cmpi ne, %11, %c0_i32_4 : i32
    scf.if %12 {
      %c0_i32_7 = arith.constant 0 : i32
      %c16_i32_8 = arith.constant 16 : i32
      %16 = arith.muli %c0_i32_7, %c16_i32_8 : i32
      %17 = tpu.assume_multiple %16, 16 : i32
      %18 = arith.index_cast %17 : i32 to index
      %c0 = arith.constant 0 : index
      %19 = vector.load %arg2[%18, %c0] : memref<16x128xf32, #tpu.memory_space<vmem>>, vector<16x128xf32>
      %20 = arith.index_cast %17 : i32 to index
      %c0_9 = arith.constant 0 : index
      %21 = vector.load %arg3[%20, %c0_9] : memref<16x128xf32, #tpu.memory_space<vmem>>, vector<16x128xf32>
      %22 = tpu.iota {dimensions = array<i32: 0>} : vector<16x128xi32>
      %23 = arith.addi %5, %17 : i32
      %24 = vector.broadcast %23 : i32 to vector<16x128xi32>
      %25 = arith.addi %24, %22 : vector<16x128xi32>
      %c16_i32_10 = arith.constant 16 : i32
      %26 = vector.broadcast %c16_i32_10 : i32 to vector<16x128xi32>
      %27 = arith.cmpi slt, %25, %26 : vector<16x128xi32>
      %28 = arith.cmpf ogt, %19, %21 : vector<16x128xf32>
      %29 = arith.andi %28, %27 : vector<16x128xi1>
      %30 = arith.subf %19, %21 : vector<16x128xf32>
      %cst = arith.constant 0.000000e+00 : f32
      %31 = vector.broadcast %cst : f32 to vector<16x128xf32>
      %32 = arith.select %29, %30, %31 : vector<16x128xi1>, vector<16x128xf32>
      %c0_11 = arith.constant 0 : index
      %c0_12 = arith.constant 0 : index
      %c0_13 = arith.constant 0 : index
      %33 = vector.load %arg5[%c0_11, %c0_12, %c0_13] : memref<2x8x128xf32, #tpu.memory_space<vmem>>, vector<1x8x128xf32>
      %34 = vector.shape_cast %33 : vector<1x8x128xf32> to vector<8x128xf32>
      %35 = vector.shape_cast %32 : vector<16x128xf32> to vector<2x8x128xf32>
      %cst_14 = arith.constant dense<0.000000e+00> : vector<8x128xf32>
      %36 = vector.multi_reduction <add>, %35, %cst_14 [0] : vector<2x8x128xf32> to vector<8x128xf32>
      %37 = arith.addf %34, %36 : vector<8x128xf32>
      %c0_15 = arith.constant 0 : index
      %c0_16 = arith.constant 0 : index
      %c0_17 = arith.constant 0 : index
      %38 = vector.load %arg5[%c0_15, %c0_16, %c0_17] : memref<2x8x128xf32, #tpu.memory_space<vmem>>, vector<1x8x128xf32>
      %39 = vector.shape_cast %38 : vector<1x8x128xf32> to vector<8x128xf32>
      %40 = vector.shape_cast %37 : vector<8x128xf32> to vector<1x8x128xf32>
      tpu.vector_store %arg5[%c0_15, %c0_16, %c0_17], %40 {strides = array<i32>} : memref<2x8x128xf32, #tpu.memory_space<vmem>>, vector<1x8x128xf32>,
      %c1 = arith.constant 1 : index
      %c0_18 = arith.constant 0 : index
      %c0_19 = arith.constant 0 : index
      %41 = vector.load %arg5[%c1, %c0_18, %c0_19] : memref<2x8x128xf32, #tpu.memory_space<vmem>>, vector<1x8x128xf32>
      %42 = vector.shape_cast %41 : vector<1x8x128xf32> to vector<8x128xf32>
      %43 = arith.extui %29 : vector<16x128xi1> to vector<16x128xi32>
      %44 = arith.sitofp %43 : vector<16x128xi32> to vector<16x128xf32>
      %45 = vector.shape_cast %44 : vector<16x128xf32> to vector<2x8x128xf32>
      %cst_20 = arith.constant dense<0.000000e+00> : vector<8x128xf32>
      %46 = vector.multi_reduction <add>, %45, %cst_20 [0] : vector<2x8x128xf32> to vector<8x128xf32>
      %47 = arith.addf %42, %46 : vector<8x128xf32>
      %c1_21 = arith.constant 1 : index
      %c0_22 = arith.constant 0 : index
      %c0_23 = arith.constant 0 : index
      %48 = vector.load %arg5[%c1_21, %c0_22, %c0_23] : memref<2x8x128xf32, #tpu.memory_space<vmem>>, vector<1x8x128xf32>
      %49 = vector.shape_cast %48 : vector<1x8x128xf32> to vector<8x128xf32>
      %50 = vector.shape_cast %47 : vector<8x128xf32> to vector<1x8x128xf32>
      tpu.vector_store %arg5[%c1_21, %c0_22, %c0_23], %50 {strides = array<i32>} : memref<2x8x128xf32, #tpu.memory_space<vmem>>, vector<1x8x128xf32>,
      %c1_i32_24 = arith.constant 1 : i32
    } else {
    }
    %c0_i32_5 = arith.constant 0 : i32
    %13 = arith.cmpi eq, %arg1, %c0_i32_5 : i32
    %14 = arith.extui %13 : i1 to i32
    %c0_i32_6 = arith.constant 0 : i32
    %15 = arith.cmpi ne, %14, %c0_i32_6 : i32
    scf.if %15 {
      %c0 = arith.constant 0 : index
      %c0_7 = arith.constant 0 : index
      %c0_8 = arith.constant 0 : index
      %16 = vector.load %arg5[%c0, %c0_7, %c0_8] : memref<2x8x128xf32, #tpu.memory_space<vmem>>, vector<2x8x128xf32>
      %c0_9 = arith.constant 0 : index
      %c0_10 = arith.constant 0 : index
      %c0_11 = arith.constant 0 : index
      %c0_12 = arith.constant 0 : index
      %17 = vector.load %arg4[%c0_9, %c0_10, %c0_11, %c0_12] : memref<1x2x8x128xf32, #tpu.memory_space<vmem>>, vector<1x2x8x128xf32>
      %18 = vector.shape_cast %17 : vector<1x2x8x128xf32> to vector<2x8x128xf32>
      %19 = vector.shape_cast %16 : vector<2x8x128xf32> to vector<1x2x8x128xf32>
      tpu.vector_store %arg4[%c0_9, %c0_10, %c0_11, %c0_12], %19 {strides = array<i32>} : memref<1x2x8x128xf32, #tpu.memory_space<vmem>>, vector<1x2x8x128xf32>,
    } else {
    }
    return
  }
  func.func @transform_0(%arg0: i32, %arg1: i32) -> (i32, i32) {
    %c1_i32 = arith.constant 1 : i32
    %0 = arith.muli %arg0, %c1_i32 : i32
    %1 = arith.addi %0, %arg1 : i32
    %c0_i32 = arith.constant 0 : i32
    %2 = arith.minsi %1, %c0_i32 : i32
    %c0_i32_0 = arith.constant 0 : i32
    %c0_i32_1 = arith.constant 0 : i32
    return %2, %c0_i32_0 : i32, i32
  }
  func.func @transform_1(%arg0: i32, %arg1: i32) -> (i32, i32) {
    %c1_i32 = arith.constant 1 : i32
    %0 = arith.muli %arg0, %c1_i32 : i32
    %1 = arith.addi %0, %arg1 : i32
    %c0_i32 = arith.constant 0 : i32
    %2 = arith.minsi %1, %c0_i32 : i32
    %c0_i32_0 = arith.constant 0 : i32
    %c0_i32_1 = arith.constant 0 : i32
    return %2, %c0_i32_0 : i32, i32
  }
  func.func @transform_2(%arg0: i32, %arg1: i32) -> (i32, i32, i32, i32) {
    %c0_i32 = arith.constant 0 : i32
    %c0_i32_0 = arith.constant 0 : i32
    %c0_i32_1 = arith.constant 0 : i32
    %c0_i32_2 = arith.constant 0 : i32
    return %arg0, %c0_i32, %c0_i32_0, %c0_i32_1 : i32, i32, i32, i32
  }
}

</mosaic_0001>

<bundles_post_ra>
// kernel: tpu_custom_call.1
= control target key start
LH: loop header
LB: loop body
LE: loop exit
PB: predicated region body
PF: predicated region fallthrough
CT: control target
= control target key end

     0   :  { %7 = vsyncpa [#allocation4], 0  ;;  %s311_s0 = inlined_call_operand.hbm [shape: f32[16,128], index: 0, kind: input, shape index: {}]   ;;  %s312_s1 = inlined_call_operand.hbm [shape: f32[16,128], index: 1, kind: input, shape index: {}]   ;;  %s313_s2 = inlined_call_operand.hbm [shape: f32[1,2,8,128], index: 2, kind: output, shape index: {}]  }
   0x1   :  { %8 = vsyncpa [#allocation7], 0 }
   0x2   :  { %9 = vsyncpa [#allocation5], 0  ;;  %s245_s9 = smov [#allocation3]   ;;  %s173_s13 = scalar_lea.hbm %s311_s0, 256 }
   0x3   :  { %s21_s10 = sshll.u32 %s245_s9, 4  ;;  %p174_p0 = scmp.ne.s32.totalorder %s311_s0, %s173_s13  ;;  %s22_s10 = int_to_ptr.vmem [resolvable:$true] %s21_s10 }
   0x4   :  { %p177_p1 = scmp.lt.u32.totalorder %s173_s13, %s311_s0 }
   0x6   :  { %p179_p2 = pnand %p177_p1, %p174_p0 }
   0x8   :  { %182 = shalt.err (!%p179_p2)
}
   0x9   :  { %s183_s18 = scalar_lea.vmem %s22_s10, 256  ;;  %p188_p4 = scmp.lt.s32.totalorder %s22_s10, %s22_s10 }
   0xa   :  { %p184_p3 = scmp.ne.s32.totalorder %s22_s10, %s183_s18  ;;  %p189_p5 = scmp.lt.s32.totalorder %s183_s18, %s183_s18 }
   0xc   :  { %p190_p6 = por %p189_p5, %p188_p4 }
   0xe   :  { %p191_p7 = pnand %p190_p6, %p184_p3 }
  0x10   :  { %194 = shalt.err (!%p191_p7)
}
  0x11   :  { %s246_s19 = smov 128   ;;  %s247_s20 = smov 8  }
  0x12   :  { %27 = dma.hbm_to_vmem [thread:$0]  %s311_s0, 256, %s22_s10, [#allocation4], %s246_s19, %s246_s19, %s247_s20  }
  0x13   :  { %s248_s23 = smov [#allocation6]   ;;  %s195_s27 = scalar_lea.hbm %s312_s1, 256 }
  0x14   :  { %s39_s24 = sshll.u32 %s248_s23, 4  ;;  %p196_p8 = scmp.ne.s32.totalorder %s312_s1, %s195_s27  ;;  %s40_s24 = int_to_ptr.vmem [resolvable:$true] %s39_s24 }
  0x15   :  { %p199_p9 = scmp.lt.u32.totalorder %s195_s27, %s312_s1 }
  0x17   :  { %p201_p10 = pnand %p199_p9, %p196_p8 }
  0x19   :  { %204 = shalt.err (!%p201_p10)
}
  0x1a   :  { %s205_s4 = scalar_lea.vmem %s40_s24, 256  ;;  %p210_p12 = scmp.lt.s32.totalorder %s40_s24, %s40_s24 }
  0x1b   :  { %p206_p11 = scmp.ne.s32.totalorder %s40_s24, %s205_s4  ;;  %p211_p13 = scmp.lt.s32.totalorder %s205_s4, %s205_s4 }
  0x1d   :  { %p212_p0 = por %p211_p13, %p210_p12 }
  0x1f   :  { %p213_p1 = pnand %p212_p0, %p206_p11 }
  0x21   :  { %216 = shalt.err (!%p213_p1)
}
  0x22   :  { %45 = dma.hbm_to_vmem [thread:$0]  %s312_s1, 256, %s40_s24, [#allocation7], %s246_s19, %s246_s19, %s247_s20  }
  0x23   :  { %239 = dma.done.wait [#allocation4], 256  }
  0x24   :  { %240 = vsyncadd [#allocation4], 4294967040 }
  0x25   :  { %241 = dma.done.wait [#allocation7], 256  }
  0x26   :  { %242 = vsyncadd [#allocation7], 4294967040  ;;  %v74_v0 = vld [vmem:[#allocation3] sm:$0xff]  ;;  %v75_v1 = vld [vmem:[#allocation3 + $0x8] sm:$0xff]  ;;  %v249_v6 = vmov 0.0   ;;  %s250_s6 = smov [#allocation8]  }
  0x27   :  { %v76_v2 = vld [vmem:[#allocation6] sm:$0xff]  ;;  %v77_v3 = vld [vmem:[#allocation6 + $0x8] sm:$0xff]  ;;  %s146_s7 = sshll.u32 %s250_s6, 4  ;;  %s147_s7 = int_to_ptr.vmem [resolvable:$true] %s146_s7 }
  0x28   :  { %vm78_vm0 = vcmp.gt.f32.partialorder %v74_v0, %v76_v2  ;;  %v80_v4 = vsub.f32 %v74_v0, %v76_v2  ;;  %vm79_vm1 = vcmp.gt.f32.partialorder %v75_v1, %v77_v3  ;;  %v81_v5 = vsub.f32 %v75_v1, %v77_v3  ;;  %s217_s1 = scalar_lea.vmem %s147_s7, 256  ;;  %p222_p3 = scmp.lt.s32.totalorder %s147_s7, %s147_s7 }
  0x29   :  { %v163_v7 = vsel %vm78_vm0, 1.0, %v249_v6  ;;  %v164_v9 = vsel %vm79_vm1, 1.0, %v249_v6  ;;  %p218_p2 = scmp.ne.s32.totalorder %s147_s7, %s217_s1  ;;  %p223_p4 = scmp.lt.s32.totalorder %s217_s1, %s217_s1 }
  0x2a   :  { %v82_v8 = vsel %vm78_vm0, %v80_v4, 0.0  ;;  %v83_v10 = vsel %vm79_vm1, %v81_v5, 0.0  ;;  %v94_v11 = vadd.f32 %v164_v9, %v163_v7 }
  0x2b   :  { %v85_v12 = vadd.f32 %v83_v10, %v82_v8  ;;  %p224_p5 = por %p223_p4, %p222_p3 }
  0x2c   :  { %140 = vst [vmem:[#allocation8 + $0x8] sm:$0xff] %v94_v11 }
  0x2d   :  { %139 = vst [vmem:[#allocation8] sm:$0xff] %v85_v12  ;;  %p225_p6 = pnand %p224_p5, %p218_p2 }
  0x2f   :  { %228 = shalt.err (!%p225_p6)
}
  0x30   :  { %s229_s10 = scalar_lea.hbm %s313_s2, 256 }
  0x31   :  { %p230_p7 = scmp.ne.s32.totalorder %s313_s2, %s229_s10  ;;  %p233_p8 = scmp.lt.u32.totalorder %s229_s10, %s313_s2 }
  0x33   :  { %p235_p9 = pnand %p233_p8, %p230_p7 }
  0x35   :  { %238 = shalt.err (!%p235_p9)
}
  0x36   :  { %152 = dma.vmem_to_hbm [thread:$0]  %s147_s7, 256, %s313_s2, [#allocation5], %s246_s19, %s246_s19, %s247_s20  }
  0x37   :  { %243 = dma.done.wait [#allocation5], 256  }
  0x38   :  { %244 = vsyncadd [#allocation5], 4294967040 }
  0x39   :  { %156 = vsyncpa [#allocation4], 1 }
  0x3a   :  { %157 = vsyncpa [#allocation7], 1 }
  0x3b   :  { %158 = vsyncpa [#allocation5], 1 }

</bundles_post_ra>
